<compile_context>
chip_gen: v7x
topology: tpu7x:2x2x1
jax: 0.10.0
libtpu: 0.0.40
codegen_flags: <defaults>
</compile_context>

<pallas_src>
import jax
import jax.numpy as jnp
from jax import lax
from jax.experimental import pallas as pl
from jax.experimental.pallas import tpu as pltpu

LEAKY_SLOPE = 0.2
BN_EPS = 1e-5
LANE = 128
VMEM_LIMIT = 32 * 1024 * 1024          # explicit scoped-VMEM request (safe on v5e/v6e/v7x)


def _ceil_to(a, m):
    return ((a + m - 1) // m) * m


def _pick_tile_m(m, k_pad, c_pad, in_bytes=2, out_bytes=4, budget=6 << 20):
    """Largest row tile whose double-buffered input+output slabs stay under `budget` bytes."""
    per_row = 2 * (k_pad * in_bytes + c_pad * out_bytes)          # x2: double buffering
    tm = max(8, min(1024, budget // max(per_row, 1)))
    tm = (tm // 8) * 8
    if m <= tm:
        return max(8, _ceil_to(m, 8))
    return max(128, (tm // 128) * 128) if tm >= 128 else tm


# ---------------------------------------------------------------------------
# Pallas kernels
# ---------------------------------------------------------------------------
def _down_kernel(p_ref, w_ref, o_ref):
    """LeakyReLU(0.2) -> down Conv2d row-tile (im2col matmul, bf16 MXU / f32 acc) -> ReLU."""
    p = p_ref[...].astype(jnp.float32)
    p = jnp.where(p >= 0, p, LEAKY_SLOPE * p)                     # LeakyReLU(0)=0: padding safe
    d = jnp.dot(p.astype(jnp.bfloat16), w_ref[...],
                preferred_element_type=jnp.float32)
    o_ref[...] = jnp.maximum(d, 0.0).astype(o_ref.dtype)


def _up_kernel(p_ref, w_ref, y_ref, s_ref):
    """One sub-pixel phase row-tile of ConvTranspose2d + per-tile BN partial sums."""
    y = jnp.dot(p_ref[...], w_ref[...], preferred_element_type=jnp.float32)
    y_ref[...] = y
    s_ref[...] = jnp.concatenate(
        [jnp.sum(y, axis=0, keepdims=True),
         jnp.sum(y * y, axis=0, keepdims=True)], axis=0)          # [2, C] partials


def _bn_kernel(y_ref, scale_ref, shift_ref, o_ref):
    """BatchNorm finalize: y * scale + shift (mean/rstd/gamma/beta pre-folded)."""
    o_ref[...] = y_ref[...] * scale_ref[...] + shift_ref[...]


# ---------------------------------------------------------------------------
# Glue: im2col (down path), sub-pixel decomposition (up path), layout plumbing
# ---------------------------------------------------------------------------
def _extract_patches_s2(x, k, stride):
    """x: [N, H, W, C] (already padded) -> [N*Ho*Wo, k*k*C] with patch order (kh, kw, c)."""
    N, H, W, C = x.shape
    Ho = (H - k) // stride + 1
    Wo = (W - k) // stride + 1
    rows = []
    for kh in range(k):
        cols = [x[:, kh:kh + stride * Ho:stride, kw:kw + stride * Wo:stride, :]
                for kw in range(k)]
        rows.append(jnp.stack(cols, axis=3))                      # [N, Ho, Wo, kw, C]
    pat = jnp.stack(rows, axis=3)                                 # [N, Ho, Wo, kh, kw, C]
    return pat.reshape(N * Ho * Wo, k * k * C)


@jax.jit
def unet_innermost_forward(x_nchw, w_down, w_up, gamma, beta):
    """x_nchw: [N, input_nc, H, W]; w_down: [inner_nc, input_nc, 4, 4] (Conv2d weight);
       w_up: [inner_nc, outer_nc, 4, 4] (ConvTranspose2d weight); gamma/beta: [outer_nc].
       Returns [N, input_nc + outer_nc, H, W]."""
    N, Cin, H, W = x_nchw.shape
    inner_nc = w_down.shape[0]
    outer_nc = w_up.shape[1]
    Ho, Wo = H // 2, W // 2
    M1 = N * Ho * Wo

    x = jnp.transpose(x_nchw, (0, 2, 3, 1)).astype(jnp.float32)   # NHWC, channels -> lanes

    # ---------------- down path: pad, im2col (stride 2), tiled matmul kernel ----------------
    x_pad = jnp.pad(x, ((0, 0), (1, 1), (1, 1), (0, 0)))
    p1 = _extract_patches_s2(x_pad, 4, 2).astype(jnp.bfloat16)    # [M1, 16*Cin]
    K1 = 16 * Cin
    K1p = _ceil_to(K1, LANE)
    C1p = _ceil_to(inner_nc, LANE)
    TM1 = _pick_tile_m(M1, K1p, C1p, in_bytes=2, out_bytes=2)
    M1p = _ceil_to(M1, TM1)
    p1 = jnp.pad(p1, ((0, M1p - M1), (0, K1p - K1)))
    wd = jnp.transpose(w_down, (2, 3, 1, 0)).reshape(K1, inner_nc)
    wd = jnp.pad(wd, ((0, K1p - K1), (0, C1p - inner_nc))).astype(jnp.bfloat16)

    u = pl.pallas_call(
        _down_kernel,
        out_shape=jax.ShapeDtypeStruct((M1p, C1p), jnp.bfloat16),
        grid=(M1p // TM1,),
        in_specs=[pl.BlockSpec((TM1, K1p), lambda i: (i, 0)),
                  pl.BlockSpec((K1p, C1p), lambda i: (0, 0))],
        out_specs=pl.BlockSpec((TM1, C1p), lambda i: (i, 0)),
        compiler_params=pltpu.CompilerParams(
            dimension_semantics=("parallel",),
            vmem_limit_bytes=VMEM_LIMIT),
    )(p1, wd)
    u = u[:M1, :C1p][:, :inner_nc].reshape(N, Ho, Wo, inner_nc)   # ReLU already applied

    # ---------------- up path: ConvTranspose2d(k=4,s=2,p=1) as 4 sub-pixel 2x2 convs -------
    # out[n, 2m+ph, 2w+pw, :] = sum_{dh,dw} u_pad[n, m+ph+dh, w+pw+dw, :] @ W[:, :, 3-ph-2dh, 3-pw-2dw]
    u_pad = jnp.pad(u, ((0, 0), (1, 1), (1, 1), (0, 0)))
    K2 = 4 * inner_nc
    K2p = _ceil_to(K2, LANE)
    C2p = _ceil_to(outer_nc, LANE)
    TM2 = _pick_tile_m(M1, K2p, C2p, in_bytes=2, out_bytes=4)
    M2p = _ceil_to(M1, TM2)

    p_phases, w_phases = [], []
    for ph in range(2):
        for pw in range(2):
            taps = [u_pad[:, ph + dh:ph + dh + Ho, pw + dw:pw + dw + Wo, :]
                    for dh in range(2) for dw in range(2)]
            p_phases.append(jnp.stack(taps, axis=3).reshape(M1, K2))   # (dh, dw, c) order
            wsel = w_up[:, :, [3 - ph, 1 - ph], :][:, :, :, [3 - pw, 1 - pw]]
            w_phases.append(jnp.transpose(wsel, (2, 3, 0, 1)).reshape(K2, outer_nc))
    p2 = jnp.pad(jnp.stack(p_phases, 0), ((0, 0), (0, M2p - M1), (0, K2p - K2)))
    w2 = jnp.pad(jnp.stack(w_phases, 0),
                 ((0, 0), (0, K2p - K2), (0, C2p - outer_nc))).astype(jnp.bfloat16)
    n_tiles = M2p // TM2

    y, stats = pl.pallas_call(
        _up_kernel,
        out_shape=(jax.ShapeDtypeStruct((4, M2p, C2p), jnp.float32),
                   jax.ShapeDtypeStruct((4, n_tiles, 2, C2p), jnp.float32)),
        grid=(4, n_tiles),
        in_specs=[pl.BlockSpec((None, TM2, K2p), lambda ph, i: (ph, i, 0)),
                  pl.BlockSpec((None, K2p, C2p), lambda ph, i: (ph, 0, 0))],
        out_specs=(pl.BlockSpec((None, TM2, C2p), lambda ph, i: (ph, i, 0)),
                   pl.BlockSpec((None, None, 2, C2p), lambda ph, i: (ph, i, 0, 0))),
        compiler_params=pltpu.CompilerParams(
            dimension_semantics=("parallel", "parallel"),
            vmem_limit_bytes=VMEM_LIMIT),
    )(p2, w2)

    # ---------------- BN finalize: reduce partials, fold gamma/beta, tiled normalize --------
    cnt = float(N * H * W)                                        # padded rows contribute 0
    tot = jnp.sum(stats, axis=(0, 1))                             # [2, C2p]
    mean = tot[0] / cnt
    var = jnp.maximum(tot[1] / cnt - mean * mean, 0.0)            # E[y^2] - E[y]^2, clamped
    rstd = lax.rsqrt(var + BN_EPS)
    gamma_p = jnp.pad(gamma.astype(jnp.float32), (0, C2p - outer_nc))
    beta_p = jnp.pad(beta.astype(jnp.float32), (0, C2p - outer_nc))
    scale = (gamma_p * rstd).reshape(1, C2p)
    shift = (beta_p - mean * gamma_p * rstd).reshape(1, C2p)

    y_flat = y.reshape(4 * M2p, C2p)
    y_bn = pl.pallas_call(
        _bn_kernel,
        out_shape=jax.ShapeDtypeStruct((4 * M2p, C2p), jnp.float32),
        grid=(4 * M2p // TM2,),
        in_specs=[pl.BlockSpec((TM2, C2p), lambda i: (i, 0)),
                  pl.BlockSpec((1, C2p), lambda i: (0, 0)),
                  pl.BlockSpec((1, C2p), lambda i: (0, 0))],
        out_specs=pl.BlockSpec((TM2, C2p), lambda i: (i, 0)),
        compiler_params=pltpu.CompilerParams(
            dimension_semantics=("parallel",),
            vmem_limit_bytes=VMEM_LIMIT),
    )(y_flat, scale, shift)

    # ---------------- reassemble sub-pixel phases, skip connection, back to NCHW -----------
    y_bn = y_bn.reshape(4, M2p, C2p)[:, :M1, :outer_nc]
    y5 = y_bn.reshape(2, 2, N, Ho, Wo, outer_nc)                  # (ph, pw, n, mh, mw, c)
    y_nhwc = jnp.transpose(y5, (2, 3, 0, 4, 1, 5)).reshape(N, H, W, outer_nc)

    out = jnp.concatenate([x, y_nhwc], axis=-1)                   # torch.cat([x, model(x)], 1)
    return jnp.transpose(out, (0, 3, 1, 2))


# ---------------------------------------------------------------------------
# Pure-JAX f32 reference (correctness check only)
# ---------------------------------------------------------------------------
def _reference(x_nchw, w_down, w_up, gamma, beta):
    x = jnp.transpose(x_nchw, (0, 2, 3, 1)).astype(jnp.float32)
    lr = jnp.where(x >= 0, x, LEAKY_SLOPE * x)
    wd_hwio = jnp.transpose(w_down, (2, 3, 1, 0))
    d = lax.conv_general_dilated(lr, wd_hwio, (2, 2), [(1, 1), (1, 1)],
                                 dimension_numbers=('NHWC', 'HWIO', 'NHWC'))
    u = jnp.maximum(d, 0.0)
    wu_hwio = jnp.transpose(w_up[:, :, ::-1, ::-1], (2, 3, 0, 1))
    y = lax.conv_general_dilated(u, wu_hwio, (1, 1), [(2, 2), (2, 2)],
                                 lhs_dilation=(2, 2),
                                 dimension_numbers=('NHWC', 'HWIO', 'NHWC'))
    mean = jnp.mean(y, axis=(0, 1, 2), keepdims=True)
    var = jnp.mean((y - mean) ** 2, axis=(0, 1, 2), keepdims=True)
    y = gamma * (y - mean) * lax.rsqrt(var + BN_EPS) + beta
    out = jnp.concatenate([x, y], axis=-1)
    return jnp.transpose(out, (0, 3, 1, 2))


if __name__ == "__main__":
    key = jax.random.PRNGKey(0)
    N, outer_nc, inner_nc, H, W = 2, 4, 8, 16, 16
    input_nc = outer_nc                          # input_nc=None -> outer_nc in the module
    k1, k2, k3 = jax.random.split(key, 3)

    x = jax.random.normal(k1, (N, input_nc, H, W), jnp.float32)
    bd = 1.0 / (input_nc * 16) ** 0.5            # PyTorch-style U(-1/sqrt(fan_in), 1/sqrt(fan_in))
    w_down = jax.random.uniform(k2, (inner_nc, input_nc, 4, 4), jnp.float32, -bd, bd)
    bu = 1.0 / (inner_nc * 16) ** 0.5
    w_up = jax.random.uniform(k3, (inner_nc, outer_nc, 4, 4), jnp.float32, -bu, bu)
    gamma = jnp.ones((outer_nc,), jnp.float32)   # BatchNorm2d default affine init
    beta = jnp.zeros((outer_nc,), jnp.float32)

    out = jax.block_until_ready(unet_innermost_forward(x, w_down, w_up, gamma, beta))
    ref = jax.block_until_ready(_reference(x, w_down, w_up, gamma, beta))

    assert out.shape == (N, input_nc + outer_nc, H, W), out.shape
    max_err = float(jnp.max(jnp.abs(out - ref)))
    # bf16 MXU inputs (f32 accumulate) vs f32 reference -> slightly loosened tolerance
    assert jnp.allclose(out, ref, atol=5e-2, rtol=5e-2), max_err
    print("KERNEL_OK")
</pallas_src>

<mosaic_0001>
module attributes {stable_mosaic.version = 11 : i64} {
  func.func @_down_kernel(%arg0: i32, %arg1: memref<128x128xbf16, #tpu.memory_space<vmem>>, %arg2: memref<128x128xbf16, #tpu.memory_space<vmem>>, %arg3: memref<128x128xbf16, #tpu.memory_space<vmem>>) attributes {dimension_semantics = [#tpu.dimension_semantics<parallel>], iteration_bounds = array<i64: 1>, scalar_prefetch = 0 : i64, scratch_operands = 0 : i64, tpu.core_type = #tpu.core_type<tc>, window_params = [{transform_indices = @transform_0, window_bounds = array<i64: 128, 128>}, {pipeline_mode = #tpu.pipeline_mode<synchronous>, transform_indices = @transform_1, window_bounds = array<i64: 128, 128>}, {transform_indices = @transform_2, window_bounds = array<i64: 128, 128>}]} {
    %c0 = arith.constant 0 : index
    %c0_0 = arith.constant 0 : index
    %0 = vector.load %arg1[%c0, %c0_0] : memref<128x128xbf16, #tpu.memory_space<vmem>>, vector<128x128xbf16>
    %1 = arith.extf %0 : vector<128x128xbf16> to vector<128x128xf32>
    %cst = arith.constant 0.000000e+00 : f32
    %2 = vector.broadcast %cst : f32 to vector<128x128xf32>
    %3 = arith.cmpf oge, %1, %2 : vector<128x128xf32>
    %cst_1 = arith.constant 2.000000e-01 : f32
    %4 = vector.broadcast %cst_1 : f32 to vector<128x128xf32>
    %5 = arith.mulf %4, %1 : vector<128x128xf32>
    %6 = arith.select %3, %1, %5 : vector<128x128xi1>, vector<128x128xf32>
    %7 = arith.truncf %6 : vector<128x128xf32> to vector<128x128xbf16>
    %c0_2 = arith.constant 0 : index
    %c0_3 = arith.constant 0 : index
    %8 = vector.load %arg2[%c0_2, %c0_3] : memref<128x128xbf16, #tpu.memory_space<vmem>>, vector<128x128xbf16>
    %cst_4 = arith.constant dense<0.000000e+00> : vector<128x128xf32>
    %9 = tpu.matmul %7, %8, %cst_4 {dimension_numbers = #tpu.dot_dimension_numbers<[1], [0], [0], [1], [0, 0, 1, 1], [], []>} : vector<128x128xbf16>, vector<128x128xbf16>, vector<128x128xf32> -> vector<128x128xf32>
    %cst_5 = arith.constant 0.000000e+00 : f32
    %10 = vector.broadcast %cst_5 : f32 to vector<128x128xf32>
    %11 = arith.maximumf %9, %10 : vector<128x128xf32>
    %12 = arith.truncf %11 : vector<128x128xf32> to vector<128x128xbf16>
    %c0_6 = arith.constant 0 : index
    %c0_7 = arith.constant 0 : index
    %13 = vector.load %arg3[%c0_6, %c0_7] : memref<128x128xbf16, #tpu.memory_space<vmem>>, vector<128x128xbf16>
    tpu.vector_store %arg3[%c0_6, %c0_7], %12 {strides = array<i32>} : memref<128x128xbf16, #tpu.memory_space<vmem>>, vector<128x128xbf16>,
    return
  }
  func.func @transform_0(%arg0: i32) -> (i32, i32) {
    %c0_i32 = arith.constant 0 : i32
    %c0_i32_0 = arith.constant 0 : i32
    return %arg0, %c0_i32 : i32, i32
  }
  func.func @transform_1(%arg0: i32) -> (i32, i32) {
    %c0_i32 = arith.constant 0 : i32
    %c0_i32_0 = arith.constant 0 : i32
    %c0_i32_1 = arith.constant 0 : i32
    return %c0_i32, %c0_i32_0 : i32, i32
  }
  func.func @transform_2(%arg0: i32) -> (i32, i32) {
    %c0_i32 = arith.constant 0 : i32
    %c0_i32_0 = arith.constant 0 : i32
    return %arg0, %c0_i32 : i32, i32
  }
}

module attributes {stable_mosaic.version = 11 : i64} {
  func.func @_up_kernel(%arg0: i32, %arg1: i32, %arg2: memref<1x128x128xbf16, #tpu.memory_space<vmem>>, %arg3: memref<1x128x128xbf16, #tpu.memory_space<vmem>>, %arg4: memref<1x128x128xf32, #tpu.memory_space<vmem>>, %arg5: memref<1x1x2x128xf32, #tpu.memory_space<vmem>>) attributes {dimension_semantics = [#tpu.dimension_semantics<parallel>, #tpu.dimension_semantics<parallel>], iteration_bounds = array<i64: 4, 1>, scalar_prefetch = 0 : i64, scratch_operands = 0 : i64, tpu.core_type = #tpu.core_type<tc>, window_params = [{transform_indices = @transform_0, window_bounds = array<i64: 1, 128, 128>}, {transform_indices = @transform_1, window_bounds = array<i64: 1, 128, 128>}, {transform_indices = @transform_2, window_bounds = array<i64: 1, 128, 128>}, {transform_indices = @transform_3, window_bounds = array<i64: 1, 1, 2, 128>}]} {
    %c0 = arith.constant 0 : index
    %c0_0 = arith.constant 0 : index
    %c0_1 = arith.constant 0 : index
    %0 = vector.load %arg2[%c0, %c0_0, %c0_1] : memref<1x128x128xbf16, #tpu.memory_space<vmem>>, vector<1x128x128xbf16>
    %1 = vector.shape_cast %0 : vector<1x128x128xbf16> to vector<128x128xbf16>
    %c0_2 = arith.constant 0 : index
    %c0_3 = arith.constant 0 : index
    %c0_4 = arith.constant 0 : index
    %2 = vector.load %arg3[%c0_2, %c0_3, %c0_4] : memref<1x128x128xbf16, #tpu.memory_space<vmem>>, vector<1x128x128xbf16>
    %3 = vector.shape_cast %2 : vector<1x128x128xbf16> to vector<128x128xbf16>
    %cst = arith.constant dense<0.000000e+00> : vector<128x128xf32>
    %4 = tpu.matmul %1, %3, %cst {dimension_numbers = #tpu.dot_dimension_numbers<[1], [0], [0], [1], [0, 0, 1, 1], [], []>} : vector<128x128xbf16>, vector<128x128xbf16>, vector<128x128xf32> -> vector<128x128xf32>
    %c0_5 = arith.constant 0 : index
    %c0_6 = arith.constant 0 : index
    %c0_7 = arith.constant 0 : index
    %5 = vector.load %arg4[%c0_5, %c0_6, %c0_7] : memref<1x128x128xf32, #tpu.memory_space<vmem>>, vector<1x128x128xf32>
    %6 = vector.shape_cast %5 : vector<1x128x128xf32> to vector<128x128xf32>
    %7 = vector.shape_cast %4 : vector<128x128xf32> to vector<1x128x128xf32>
    tpu.vector_store %arg4[%c0_5, %c0_6, %c0_7], %7 {strides = array<i32>} : memref<1x128x128xf32, #tpu.memory_space<vmem>>, vector<1x128x128xf32>,
    %cst_8 = arith.constant dense<0.000000e+00> : vector<128xf32>
    %8 = vector.multi_reduction <add>, %4, %cst_8 [0] : vector<128x128xf32> to vector<128xf32>
    %9 = vector.shape_cast %8 : vector<128xf32> to vector<1x128xf32>
    %10 = arith.mulf %4, %4 : vector<128x128xf32>
    %cst_9 = arith.constant dense<0.000000e+00> : vector<128xf32>
    %11 = vector.multi_reduction <add>, %10, %cst_9 [0] : vector<128x128xf32> to vector<128xf32>
    %12 = vector.shape_cast %11 : vector<128xf32> to vector<1x128xf32>
    %13 = tpu.concatenate %9, %12 in 0 : vector<1x128xf32>, vector<1x128xf32> -> vector<2x128xf32>
    %c0_10 = arith.constant 0 : index
    %c0_11 = arith.constant 0 : index
    %c0_12 = arith.constant 0 : index
    %c0_13 = arith.constant 0 : index
    %14 = vector.load %arg5[%c0_10, %c0_11, %c0_12, %c0_13] : memref<1x1x2x128xf32, #tpu.memory_space<vmem>>, vector<1x1x2x128xf32>
    %15 = vector.shape_cast %14 : vector<1x1x2x128xf32> to vector<2x128xf32>
    %16 = vector.shape_cast %13 : vector<2x128xf32> to vector<1x1x2x128xf32>
    tpu.vector_store %arg5[%c0_10, %c0_11, %c0_12, %c0_13], %16 {strides = array<i32>} : memref<1x1x2x128xf32, #tpu.memory_space<vmem>>, vector<1x1x2x128xf32>,
    return
  }
  func.func @transform_0(%arg0: i32, %arg1: i32) -> (i32, i32, i32) {
    %c0_i32 = arith.constant 0 : i32
    %c0_i32_0 = arith.constant 0 : i32
    return %arg0, %arg1, %c0_i32 : i32, i32, i32
  }
  func.func @transform_1(%arg0: i32, %arg1: i32) -> (i32, i32, i32) {
    %c0_i32 = arith.constant 0 : i32
    %c0_i32_0 = arith.constant 0 : i32
    %c0_i32_1 = arith.constant 0 : i32
    return %arg0, %c0_i32, %c0_i32_0 : i32, i32, i32
  }
  func.func @transform_2(%arg0: i32, %arg1: i32) -> (i32, i32, i32) {
    %c0_i32 = arith.constant 0 : i32
    %c0_i32_0 = arith.constant 0 : i32
    return %arg0, %arg1, %c0_i32 : i32, i32, i32
  }
  func.func @transform_3(%arg0: i32, %arg1: i32) -> (i32, i32, i32, i32) {
    %c0_i32 = arith.constant 0 : i32
    %c0_i32_0 = arith.constant 0 : i32
    %c0_i32_1 = arith.constant 0 : i32
    return %arg0, %arg1, %c0_i32, %c0_i32_0 : i32, i32, i32, i32
  }
}

module attributes {stable_mosaic.version = 11 : i64} {
  func.func @_bn_kernel(%arg0: i32, %arg1: memref<128x128xf32, #tpu.memory_space<vmem>>, %arg2: memref<1x128xf32, #tpu.memory_space<vmem>>, %arg3: memref<1x128xf32, #tpu.memory_space<vmem>>, %arg4: memref<128x128xf32, #tpu.memory_space<vmem>>) attributes {dimension_semantics = [#tpu.dimension_semantics<parallel>], iteration_bounds = array<i64: 4>, scalar_prefetch = 0 : i64, scratch_operands = 0 : i64, tpu.core_type = #tpu.core_type<tc>, window_params = [{transform_indices = @transform_0, window_bounds = array<i64: 128, 128>}, {pipeline_mode = #tpu.pipeline_mode<synchronous>, transform_indices = @transform_1, window_bounds = array<i64: 1, 128>}, {pipeline_mode = #tpu.pipeline_mode<synchronous>, transform_indices = @transform_2, window_bounds = array<i64: 1, 128>}, {transform_indices = @transform_3, window_bounds = array<i64: 128, 128>}]} {
    %c0 = arith.constant 0 : index
    %c0_0 = arith.constant 0 : index
    %0 = vector.load %arg1[%c0, %c0_0] : memref<128x128xf32, #tpu.memory_space<vmem>>, vector<128x128xf32>
    %c0_1 = arith.constant 0 : index
    %c0_2 = arith.constant 0 : index
    %1 = vector.load %arg2[%c0_1, %c0_2] : memref<1x128xf32, #tpu.memory_space<vmem>>, vector<1x128xf32>
    %2 = vector.broadcast %1 : vector<1x128xf32> to vector<128x128xf32>
    %3 = arith.mulf %0, %2 : vector<128x128xf32>
    %c0_3 = arith.constant 0 : index
    %c0_4 = arith.constant 0 : index
    %4 = vector.load %arg3[%c0_3, %c0_4] : memref<1x128xf32, #tpu.memory_space<vmem>>, vector<1x128xf32>
    %5 = vector.broadcast %4 : vector<1x128xf32> to vector<128x128xf32>
    %6 = arith.addf %3, %5 : vector<128x128xf32>
    %c0_5 = arith.constant 0 : index
    %c0_6 = arith.constant 0 : index
    %7 = vector.load %arg4[%c0_5, %c0_6] : memref<128x128xf32, #tpu.memory_space<vmem>>, vector<128x128xf32>
    tpu.vector_store %arg4[%c0_5, %c0_6], %6 {strides = array<i32>} : memref<128x128xf32, #tpu.memory_space<vmem>>, vector<128x128xf32>,
    return
  }
  func.func @transform_0(%arg0: i32) -> (i32, i32) {
    %c0_i32 = arith.constant 0 : i32
    %c0_i32_0 = arith.constant 0 : i32
    return %arg0, %c0_i32 : i32, i32
  }
  func.func @transform_1(%arg0: i32) -> (i32, i32) {
    %c0_i32 = arith.constant 0 : i32
    %c0_i32_0 = arith.constant 0 : i32
    %c0_i32_1 = arith.constant 0 : i32
    return %c0_i32, %c0_i32_0 : i32, i32
  }
  func.func @transform_2(%arg0: i32) -> (i32, i32) {
    %c0_i32 = arith.constant 0 : i32
    %c0_i32_0 = arith.constant 0 : i32
    %c0_i32_1 = arith.constant 0 : i32
    return %c0_i32, %c0_i32_0 : i32, i32
  }
  func.func @transform_3(%arg0: i32) -> (i32, i32) {
    %c0_i32 = arith.constant 0 : i32
    %c0_i32_0 = arith.constant 0 : i32
    return %arg0, %c0_i32 : i32, i32
  }
}

</mosaic_0001>

<bundles_post_ra>
// kernel: unet_innermost_forward.3
= control target key start
LH: loop header
LB: loop body
LE: loop exit
PB: predicated region body
PF: predicated region fallthrough
CT: control target
= control target key end

     0   :  { %s648_s1 = inlined_call_operand.vmem [shape: bf16[128,128], index: 1, kind: input, shape index: {}]   ;;  %s649_s0 = inlined_call_operand.vmem [shape: bf16[128,128], index: 0, kind: input, shape index: {}]   ;;  %s650_s2 = inlined_call_operand.vmem [shape: bf16[128,128], index: 2, kind: output, shape index: {}]  }
   0x1   :  { %v551_v0 = vld [vmem:[%s648_s1] sm:$0xff]   ;;  %v552_v1 = vld [vmem:[%s648_s1 + $0x8] sm:$0xff]   ;;  %v553_v2 = vld [vmem:[%s648_s1 + $0x10] sm:$0xff]  }
   0x2   :  { %503 = vmatprep.subr.bf16.mxu0 %v551_v0  ;;  %535 = vmatprep.subr.bf16.mxu1 %v551_v0  ;;  %v554_v3 = vld [vmem:[%s648_s1 + $0x18] sm:$0xff]   ;;  %v402_v4 = vld [vmem:[%s649_s0] sm:$0xff]   ;;  %v473_v20 = vld [vmem:[%s649_s0 + $0x8] sm:$0xff]  }
   0x3   :  { %504 = vmatpush3.bf16.msra.mxu0 %v551_v0  ;;  %543 = vmatpush3.bf16.msra.mxu1 %v551_v0  ;;  %v476_v5 = vld [vmem:[%s649_s0 + $0x20] sm:$0xff]   ;;  %v403_v6 = vunpack.c.l.bf16 %v402_v4  ;;  %v404_v7 = vunpack.c.h.bf16 %v402_v4  ;;  %v477_v22 = vld [vmem:[%s649_s0 + $0x28] sm:$0xff]   ;;  %v474_v23 = vld [vmem:[%s649_s0 + $0x10] sm:$0xff]   ;;  %v407_v25 = vunpack.c.l.bf16 %v473_v20  ;;  %v408_v26 = vunpack.c.h.bf16 %v473_v20 }
   0x4   :  { %505 = vmatprep.subr.bf16.mxu0 %v552_v1  ;;  %536 = vmatprep.subr.bf16.mxu1 %v552_v1  ;;  %v419_v8 = vunpack.c.l.bf16 %v476_v5  ;;  %v420_v9 = vunpack.c.h.bf16 %v476_v5  ;;  %v555_v10 = vld [vmem:[%s648_s1 + $0x20] sm:$0xff]   ;;  %v556_v24 = vld [vmem:[%s648_s1 + $0x28] sm:$0xff]   ;;  %v478_v27 = vld [vmem:[%s649_s0 + $0x30] sm:$0xff]   ;;  %v423_v28 = vunpack.c.l.bf16 %v477_v22  ;;  %v424_v29 = vunpack.c.h.bf16 %v477_v22 }
   0x5   :  { %vm44_vm0 = vcmp.ge.f32.partialorder %v403_v6, 0.0  ;;  %vm45_vm1 = vcmp.ge.f32.partialorder %v404_v7, 0.0  ;;  %v60_v11 = vmul.f32 0.2, %v403_v6  ;;  %v61_v12 = vmul.f32 0.2, %v404_v7 }
   0x6   :  { %vm52_vm2 = vcmp.ge.f32.partialorder %v419_v8, 0.0  ;;  %vm53_vm3 = vcmp.ge.f32.partialorder %v420_v9, 0.0  ;;  %v68_v13 = vmul.f32 0.2, %v419_v8  ;;  %v69_v14 = vmul.f32 0.2, %v420_v9 }
   0x7   :  { %506 = vmatpush3.bf16.msra.mxu0 %v552_v1  ;;  %544 = vmatpush3.bf16.msra.mxu1 %v552_v1  ;;  %v76_v15 = vsel %vm44_vm0, %v403_v6, %v60_v11  ;;  %v77_v16 = vsel %vm45_vm1, %v404_v7, %v61_v12  ;;  %v411_v30 = vunpack.c.l.bf16 %v474_v23  ;;  %v412_v31 = vunpack.c.h.bf16 %v474_v23  ;;  %v557_v32 = vld [vmem:[%s648_s1 + $0x30] sm:$0xff]   ;;  %v558_v37 = vld [vmem:[%s648_s1 + $0x38] sm:$0xff]  }
   0x8   :  { %507 = vmatprep.subr.bf16.mxu0 %v553_v2  ;;  %537 = vmatprep.subr.bf16.mxu1 %v553_v2  ;;  %v92_v17 = vpack.c.bf16 %v77_v16, %v76_v15  ;;  %v84_v18 = vsel %vm52_vm2, %v419_v8, %v68_v13  ;;  %v85_v19 = vsel %vm53_vm3, %v420_v9, %v69_v14  ;;  %v427_v33 = vunpack.c.l.bf16 %v478_v27  ;;  %v475_v42 = vld [vmem:[%s649_s0 + $0x18] sm:$0xff]  }
   0x9   :  { %v96_v21 = vpack.c.bf16 %v85_v19, %v84_v18  ;;  %v428_v34 = vunpack.c.h.bf16 %v478_v27  ;;  %vm46_vm4 = vcmp.ge.f32.partialorder %v407_v25, 0.0  ;;  %vm47_vm5 = vcmp.ge.f32.partialorder %v408_v26, 0.0  ;;  %v479_v45 = vld [vmem:[%s649_s0 + $0x38] sm:$0xff]  }
   0xa   :  { %519 = vmatprep.mubr.bf16.mxu0 %v92_v17  ;;  %v62_v35 = vmul.f32 0.2, %v407_v25  ;;  %v63_v36 = vmul.f32 0.2, %v408_v26  ;;  %v70_v38 = vmul.f32 0.2, %v423_v28  ;;  %v415_v51 = vunpack.c.l.bf16 %v475_v42 }
   0xb   :  { %508 = vmatpush3.bf16.msra.mxu0 %v553_v2  ;;  %545 = vmatpush3.bf16.msra.mxu1 %v553_v2  ;;  %v71_v39 = vmul.f32 0.2, %v424_v29  ;;  %v64_v40 = vmul.f32 0.2, %v411_v30  ;;  %vm54_vm6 = vcmp.ge.f32.partialorder %v423_v28, 0.0  ;;  %vm55_vm7 = vcmp.ge.f32.partialorder %v424_v29, 0.0 }
   0xc   :  { %509 = vmatprep.subr.bf16.mxu0 %v554_v3  ;;  %538 = vmatprep.subr.bf16.mxu1 %v554_v3  ;;  %vm48_vm8 = vcmp.ge.f32.partialorder %v411_v30, 0.0  ;;  %v65_v41 = vmul.f32 0.2, %v412_v31  ;;  %vm49_vm9 = vcmp.ge.f32.partialorder %v412_v31, 0.0  ;;  %v72_v43 = vmul.f32 0.2, %v427_v33 }
   0xd   :  { %527 = vmatprep.mubr.bf16.mxu1 %v96_v21  ;;  %v73_v44 = vmul.f32 0.2, %v428_v34  ;;  %v78_v46 = vsel %vm46_vm4, %v407_v25, %v62_v35  ;;  %v79_v47 = vsel %vm47_vm5, %v408_v26, %v63_v36  ;;  %vm56_vm10 = vcmp.ge.f32.partialorder %v427_v33, 0.0 }
   0xe   :  { %vm57_vm11 = vcmp.ge.f32.partialorder %v428_v34, 0.0  ;;  %v86_v48 = vsel %vm54_vm6, %v423_v28, %v70_v38  ;;  %v87_v49 = vsel %vm55_vm7, %v424_v29, %v71_v39  ;;  %v80_v50 = vsel %vm48_vm8, %v411_v30, %v64_v40 }
   0xf   :  { %510 = vmatpush3.bf16.msra.mxu0 %v554_v3  ;;  %546 = vmatpush3.bf16.msra.mxu1 %v554_v3  ;;  %v81_v52 = vsel %vm49_vm9, %v412_v31, %v65_v41  ;;  %v416_v53 = vunpack.c.h.bf16 %v475_v42  ;;  %v431_v54 = vunpack.c.l.bf16 %v479_v45  ;;  %v432_v55 = vunpack.c.h.bf16 %v479_v45 }
  0x10   :  { %511 = vmatprep.subr.bf16.mxu0 %v555_v10  ;;  %539 = vmatprep.subr.bf16.mxu1 %v555_v10  ;;  %v88_v56 = vsel %vm56_vm10, %v427_v33, %v72_v43  ;;  %v89_v57 = vsel %vm57_vm11, %v428_v34, %v73_v44  ;;  %v93_v58 = vpack.c.bf16 %v79_v47, %v78_v46  ;;  %vm50_vm12 = vcmp.ge.f32.partialorder %v415_v51, 0.0 }
  0x11   :  { %v97_v59 = vpack.c.bf16 %v87_v49, %v86_v48  ;;  %v94_v60 = vpack.c.bf16 %v81_v52, %v80_v50  ;;  %v66_v61 = vmul.f32 0.2, %v415_v51  ;;  %v98_v62 = vpack.c.bf16 %v89_v57, %v88_v56 }
  0x12   :  { %v67_v63 = vmul.f32 0.2, %v416_v53  ;;  %v74_v0 = vmul.f32 0.2, %v431_v54  ;;  %v75_v1 = vmul.f32 0.2, %v432_v55 }
  0x13   :  { %512 = vmatpush3.bf16.msra.mxu0 %v555_v10  ;;  %547 = vmatpush3.bf16.msra.mxu1 %v555_v10  ;;  %vm51_vm13 = vcmp.ge.f32.partialorder %v416_v53, 0.0  ;;  %vm58_vm14 = vcmp.ge.f32.partialorder %v431_v54, 0.0  ;;  %vm59_vm15 = vcmp.ge.f32.partialorder %v432_v55, 0.0  ;;  %v82_v2 = vsel %vm50_vm12, %v415_v51, %v66_v61 }
  0x14   :  { %513 = vmatprep.subr.bf16.mxu0 %v556_v24  ;;  %540 = vmatprep.subr.bf16.mxu1 %v556_v24  ;;  %v83_v3 = vsel %vm51_vm13, %v416_v53, %v67_v63  ;;  %v90_v4 = vsel %vm58_vm14, %v431_v54, %v74_v0  ;;  %v91_v5 = vsel %vm59_vm15, %v432_v55, %v75_v1 }
  0x15   :  { %v95_v6 = vpack.c.bf16 %v83_v3, %v82_v2  ;;  %v99_v7 = vpack.c.bf16 %v91_v5, %v90_v4 }
  0x17   :  { %514 = vmatpush3.bf16.msra.mxu0 %v556_v24  ;;  %548 = vmatpush3.bf16.msra.mxu1 %v556_v24 }
  0x18   :  { %515 = vmatprep.subr.bf16.mxu0 %v557_v32  ;;  %541 = vmatprep.subr.bf16.mxu1 %v557_v32 }
  0x1b   :  { %516 = vmatpush3.bf16.msra.mxu0 %v557_v32  ;;  %549 = vmatpush3.bf16.msra.mxu1 %v557_v32 }
  0x1c   :  { %517 = vmatprep.subr.bf16.mxu0 %v558_v37  ;;  %542 = vmatprep.subr.bf16.mxu1 %v558_v37 }
  0x1f   :  { %518 = vmatpush3.bf16.msra.mxu0 %v558_v37  ;;  %550 = vmatpush3.bf16.msra.mxu1 %v558_v37 }
  0x22   :  { %520 = vmatmul.mubr.bf16.vlgmr.msra.gmra.mrb[0].mxu0 %v93_v58  ;;  %528 = vmatmul.mubr.bf16.vlgmr.msra.gmra.mrb[0].mxu1 %v97_v59 }
  0x23   :  { %523 = vmatprep.mubr.bf16.mxu0 %v94_v60  ;;  %531 = vmatprep.mubr.bf16.mxu1 %v98_v62 }
  0x2a   :  { %524 = vmatmul.mubr.bf16.gmra.mrb[4].mxu0 %v95_v6  ;;  %532 = vmatmul.mubr.bf16.gmra.mrb[4].mxu1 %v99_v7 }
  0xf5   :  { %v521_v8 = vpop.f32.mrb[0].mxu0  ;;  %v529_v9 = vpop.f32.mrb[0].mxu1 }
  0xf6   :  { %v198_v10 = vpop.f32.mrb[1].mxu0  ;;  %v230_v11 = vpop.f32.mrb[1].mxu1  ;;  %v263_v14 = vmax.f32 %v521_v8, 0.0  ;;  %v271_v15 = vmax.f32 %v529_v9, 0.0 }
  0xf7   :  { %v522_v12 = vpop.f32.mrb[2].mxu0  ;;  %v530_v13 = vpop.f32.mrb[2].mxu1  ;;  %v261_v20 = vmax.f32 %v198_v10, 0.0  ;;  %v269_v21 = vmax.f32 %v230_v11, 0.0 }
  0xf8   :  { %v264_v16 = vmax.f32 %v522_v12, 0.0  ;;  %v272_v17 = vmax.f32 %v530_v13, 0.0  ;;  %v201_v18 = vpop.f32.mrb[3].mxu0  ;;  %v233_v19 = vpop.f32.mrb[3].mxu1 }
  0xf9   :  { %v262_v22 = vmax.f32 %v201_v18, 0.0  ;;  %v270_v23 = vmax.f32 %v233_v19, 0.0 }
  0xfa   :  { %v441_v24 = vpack.c.bf16 %v264_v16, %v263_v14  ;;  %v461_v25 = vpack.c.bf16 %v272_v17, %v271_v15 }
  0xfb   :  { %v436_v26 = vpack.c.bf16 %v262_v22, %v261_v20  ;;  %v456_v27 = vpack.c.bf16 %v270_v23, %v269_v21 }
  0xfc   :  { %480 = vst [vmem:[%s650_s2 + $0x8] sm:$0xff] %v441_v24   ;;  %484 = vst [vmem:[%s650_s2 + $0x28] sm:$0xff] %v461_v25  }
  0xfd   :  { %437 = vst [vmem:[%s650_s2] sm:$0xff] %v436_v26   ;;  %483 = vst [vmem:[%s650_s2 + $0x20] sm:$0xff] %v456_v27   ;;  %v525_v28 = vpop.f32.mrb[4].mxu0  ;;  %v533_v29 = vpop.f32.mrb[4].mxu1 }
  0xfe   :  { %v214_v30 = vpop.f32.mrb[5].mxu0  ;;  %v246_v31 = vpop.f32.mrb[5].mxu1  ;;  %v267_v34 = vmax.f32 %v525_v28, 0.0  ;;  %v275_v35 = vmax.f32 %v533_v29, 0.0 }
  0xff   :  { %v526_v32 = vpop.f32.mrb[6].mxu0  ;;  %v534_v33 = vpop.f32.mrb[6].mxu1  ;;  %v265_v40 = vmax.f32 %v214_v30, 0.0  ;;  %v273_v41 = vmax.f32 %v246_v31, 0.0 }
 0x100   :  { %v268_v36 = vmax.f32 %v526_v32, 0.0  ;;  %v276_v37 = vmax.f32 %v534_v33, 0.0  ;;  %v217_v38 = vpop.f32.mrb[7].mxu0  ;;  %v249_v39 = vpop.f32.mrb[7].mxu1 }
 0x101   :  { %v266_v42 = vmax.f32 %v217_v38, 0.0  ;;  %v274_v43 = vmax.f32 %v249_v39, 0.0 }
 0x102   :  { %v451_v44 = vpack.c.bf16 %v268_v36, %v267_v34  ;;  %v471_v45 = vpack.c.bf16 %v276_v37, %v275_v35 }
 0x103   :  { %v446_v46 = vpack.c.bf16 %v266_v42, %v265_v40  ;;  %v466_v47 = vpack.c.bf16 %v274_v43, %v273_v41 }
 0x104   :  { %482 = vst [vmem:[%s650_s2 + $0x18] sm:$0xff] %v451_v44   ;;  %486 = vst [vmem:[%s650_s2 + $0x38] sm:$0xff] %v471_v45  }
 0x105   :  { %481 = vst [vmem:[%s650_s2 + $0x10] sm:$0xff] %v446_v46   ;;  %485 = vst [vmem:[%s650_s2 + $0x30] sm:$0xff] %v466_v47  }

// kernel: unet_innermost_forward.4
= control target key start
LH: loop header
LB: loop body
LE: loop exit
PB: predicated region body
PF: predicated region fallthrough
CT: control target
= control target key end

     0   :  { %s873_s12 = smov 0   ;;  %s875_s13 = smov 0   ;;  %s955_s0 = inlined_call_operand.vmem [shape: bf16[4,128,128], index: 0, kind: input, shape index: {}]   ;;  %s956_s1 = inlined_call_operand.vmem [shape: bf16[4,128,128], index: 1, kind: input, shape index: {}]   ;;  %s957_s2 = inlined_call_operand.vmem [shape: f32[4,128,128], index: 2, kind: output, shape index: {0}]   ;;  %s958_s3 = inlined_call_operand.vmem [shape: f32[4,1,2,128], index: 3, kind: output, shape index: {1}]  }
   0x1   :  { %s877_s14 = smov 0  }
   0x2 LB: > { %s26_s15 = sadd.s32 1, %s847_s13  ;;  %p696_p0 = scmp.ge.s32.totalorder %s851_s14, 1  ;;  %s851_s14 = sphi %s877_s14, %s14_s14   ;;  %s847_s13 = sphi %s875_s13, %s960_s13   ;;  %s843_s12 = sphi %s873_s12, %s959_s12  }
   0x3   : > { %p28_p1 = scmp.ge.s32.totalorder %s26_s15, 4  ;;  %p173_p2 = scmp.lt.s32.totalorder %s851_s14, 5 }
   0x5   : > { %s962_s15 = smov (%p28_p1, %s26_s15), 0  ;;  %p174_p3 = pnand %p696_p0, %p173_p2 }
   0x6   : > { %p218_p4 = scmp.lt.s32.totalorder (!%p174_p3), %s843_s12, 3  ;;  %vm549_vm0 = vcmask (!%p174_p3), 1040384  }
   0x7   : > { %177 = sbr.rel (%p174_p3) target bundleno = 311 (0x137), region = 28 }
   0xe   : > { %s964_s12 = smov (!%p218_p4, %s843_s12), 3 }
   0xf   : > { %s722_s16 = sshll.u32 %s964_s12, 6  ;;  %s724_s23 = sshll.u32 %s964_s12, 7 }
  0x10   : > { %s897_s19 = scalar_lea.vmem %s956_s1, %s722_s16  ;;  %s905_s22 = scalar_lea.vmem %s955_s0, %s722_s16 }
  0x11   : > { %v813_v0 = vld [vmem:[%s897_s19] sm:$0xff]   ;;  %v814_v1 = vld [vmem:[%s897_s19 + $0x8] sm:$0xff]   ;;  %v815_v2 = vld [vmem:[%s897_s19 + $0x10] sm:$0xff]   ;;  %s924_s26 = scalar_lea.vmem %s957_s2, %s724_s23  ;;  %s703_s27 = sshll.u32 %s964_s12, 1 }
  0x12   : > { %741 = vmatprep.subr.bf16.mxu0 %v813_v0  ;;  %773 = vmatprep.subr.bf16.mxu1 %v813_v0  ;;  %v816_v3 = vld [vmem:[%s897_s19 + $0x18] sm:$0xff]   ;;  %v821_v4 = vld [vmem:[%s905_s22] sm:$0xff]   ;;  %v818_v7 = vld [vmem:[%s897_s19 + $0x28] sm:$0xff]   ;;  %s248_s30 = scalar_lea.vmem %s958_s3, %s703_s27 }
  0x13   : > { %742 = vmatpush3.bf16.msra.mxu0 %v813_v0  ;;  %781 = vmatpush3.bf16.msra.mxu1 %v813_v0  ;;  %v817_v5 = vld [vmem:[%s897_s19 + $0x20] sm:$0xff]   ;;  %v819_v8 = vld [vmem:[%s897_s19 + $0x30] sm:$0xff]   ;;  %v820_v9 = vld [vmem:[%s897_s19 + $0x38] sm:$0xff]  }
  0x14   : > { %743 = vmatprep.subr.bf16.mxu0 %v814_v1  ;;  %774 = vmatprep.subr.bf16.mxu1 %v814_v1  ;;  %v825_v6 = vld [vmem:[%s905_s22 + $0x20] sm:$0xff]   ;;  %v822_v10 = vld [vmem:[%s905_s22 + $0x8] sm:$0xff]   ;;  %v823_v12 = vld [vmem:[%s905_s22 + $0x10] sm:$0xff]  }
  0x15   : > { %757 = vmatprep.mubr.bf16.mxu0 %v821_v4  ;;  %765 = vmatprep.mubr.bf16.mxu1 %v825_v6  ;;  %v826_v11 = vld [vmem:[%s905_s22 + $0x28] sm:$0xff]   ;;  %v827_v13 = vld [vmem:[%s905_s22 + $0x30] sm:$0xff]   ;;  %v824_v14 = vld [vmem:[%s905_s22 + $0x18] sm:$0xff]  }
  0x16   : > { %v828_v15 = vld [vmem:[%s905_s22 + $0x38] sm:$0xff]  }
  0x17   : > { %744 = vmatpush3.bf16.msra.mxu0 %v814_v1  ;;  %782 = vmatpush3.bf16.msra.mxu1 %v814_v1 }
  0x18   : > { %745 = vmatprep.subr.bf16.mxu0 %v815_v2  ;;  %775 = vmatprep.subr.bf16.mxu1 %v815_v2 }
  0x1b   : > { %746 = vmatpush3.bf16.msra.mxu0 %v815_v2  ;;  %783 = vmatpush3.bf16.msra.mxu1 %v815_v2 }
  0x1c   : > { %747 = vmatprep.subr.bf16.mxu0 %v816_v3  ;;  %776 = vmatprep.subr.bf16.mxu1 %v816_v3 }
  0x1f   : > { %748 = vmatpush3.bf16.msra.mxu0 %v816_v3  ;;  %784 = vmatpush3.bf16.msra.mxu1 %v816_v3 }
  0x20   : > { %749 = vmatprep.subr.bf16.mxu0 %v817_v5  ;;  %777 = vmatprep.subr.bf16.mxu1 %v817_v5 }
  0x23   : > { %750 = vmatpush3.bf16.msra.mxu0 %v817_v5  ;;  %785 = vmatpush3.bf16.msra.mxu1 %v817_v5 }
  0x24   : > { %751 = vmatprep.subr.bf16.mxu0 %v818_v7  ;;  %778 = vmatprep.subr.bf16.mxu1 %v818_v7 }
  0x27   : > { %752 = vmatpush3.bf16.msra.mxu0 %v818_v7  ;;  %786 = vmatpush3.bf16.msra.mxu1 %v818_v7 }
  0x28   : > { %753 = vmatprep.subr.bf16.mxu0 %v819_v8  ;;  %779 = vmatprep.subr.bf16.mxu1 %v819_v8 }
  0x2b   : > { %754 = vmatpush3.bf16.msra.mxu0 %v819_v8  ;;  %787 = vmatpush3.bf16.msra.mxu1 %v819_v8 }
  0x2c   : > { %755 = vmatprep.subr.bf16.mxu0 %v820_v9  ;;  %780 = vmatprep.subr.bf16.mxu1 %v820_v9 }
  0x2f   : > { %756 = vmatpush3.bf16.msra.mxu0 %v820_v9  ;;  %788 = vmatpush3.bf16.msra.mxu1 %v820_v9 }
  0x32   : > { %758 = vmatmul.mubr.bf16.vlgmr.msra.gmra.mrb[0].mxu0 %v822_v10  ;;  %766 = vmatmul.mubr.bf16.vlgmr.msra.gmra.mrb[0].mxu1 %v826_v11 }
  0x33   : > { %761 = vmatprep.mubr.bf16.mxu0 %v823_v12  ;;  %769 = vmatprep.mubr.bf16.mxu1 %v827_v13 }
  0x3a   : > { %762 = vmatmul.mubr.bf16.gmra.mrb[4].mxu0 %v824_v14  ;;  %770 = vmatmul.mubr.bf16.gmra.mrb[4].mxu1 %v828_v15 }
 0x105   : > { %v759_v16 = vpop.f32.mrb[0].mxu0  ;;  %v767_v17 = vpop.f32.mrb[0].mxu1 }
 0x106   : > { %477 = vst [vmem:[%s924_s26 + $0x10] sm:$0xff] %v759_v16  ;;  %v412_v18 = vpop.f32.mrb[1].mxu0  ;;  %485 = vst [vmem:[%s924_s26 + $0x50] sm:$0xff] %v767_v17  ;;  %v444_v19 = vpop.f32.mrb[1].mxu1  ;;  %v514_v27 = vmul.f32 %v759_v16, %v759_v16  ;;  %v522_v59 = vmul.f32 %v767_v17, %v767_v17 }
 0x107   : > { %475 = vst [vmem:[%s924_s26] sm:$0xff] %v412_v18  ;;  %v760_v20 = vpop.f32.mrb[2].mxu0  ;;  %483 = vst [vmem:[%s924_s26 + $0x40] sm:$0xff] %v444_v19  ;;  %v768_v21 = vpop.f32.mrb[2].mxu1  ;;  %v512_v24 = vmul.f32 %v412_v18, %v412_v18  ;;  %v520_v53 = vmul.f32 %v444_v19, %v444_v19 }
 0x108   : > { %478 = vst [vmem:[%s924_s26 + $0x18] sm:$0xff] %v760_v20  ;;  %v415_v22 = vpop.f32.mrb[3].mxu0  ;;  %486 = vst [vmem:[%s924_s26 + $0x58] sm:$0xff] %v768_v21  ;;  %v447_v23 = vpop.f32.mrb[3].mxu1  ;;  %v515_v30 = vmul.f32 %v760_v20, %v760_v20  ;;  %v523_v62 = vmul.f32 %v768_v21, %v768_v21 }
 0x109   : > { %476 = vst [vmem:[%s924_s26 + $0x8] sm:$0xff] %v415_v22  ;;  %v491_v25 = vadd.f32 %v415_v22, %v412_v18  ;;  %v513_v26 = vmul.f32 %v415_v22, %v415_v22  ;;  %484 = vst [vmem:[%s924_s26 + $0x48] sm:$0xff] %v447_v23  ;;  %v521_v58 = vmul.f32 %v447_v23, %v447_v23 }
 0x10b   : > { %v492_v28 = vadd.f32 %v759_v16, %v491_v25  ;;  %v528_v29 = vadd.f32 %v513_v26, %v512_v24 }
 0x10d   : > { %v529_v31 = vadd.f32 %v528_v29, %v514_v27  ;;  %v763_v32 = vpop.f32.mrb[4].mxu0  ;;  %v493_v33 = vadd.f32 %v760_v20, %v492_v28  ;;  %v771_v34 = vpop.f32.mrb[4].mxu1 }
 0x10e   : > { %481 = vst [vmem:[%s924_s26 + $0x30] sm:$0xff] %v763_v32  ;;  %v428_v35 = vpop.f32.mrb[5].mxu0  ;;  %489 = vst [vmem:[%s924_s26 + $0x70] sm:$0xff] %v771_v34  ;;  %v460_v36 = vpop.f32.mrb[5].mxu1  ;;  %v518_v47 = vmul.f32 %v763_v32, %v763_v32  ;;  %v526_v7 = vmul.f32 %v771_v34, %v771_v34 }
 0x10f   : > { %479 = vst [vmem:[%s924_s26 + $0x20] sm:$0xff] %v428_v35  ;;  %v494_v37 = vadd.f32 %v493_v33, %v428_v35  ;;  %v516_v38 = vmul.f32 %v428_v35, %v428_v35  ;;  %v530_v39 = vadd.f32 %v529_v31, %v515_v30  ;;  %v764_v40 = vpop.f32.mrb[6].mxu0  ;;  %487 = vst [vmem:[%s924_s26 + $0x60] sm:$0xff] %v460_v36  ;;  %v772_v41 = vpop.f32.mrb[6].mxu1 }
 0x110   : > { %482 = vst [vmem:[%s924_s26 + $0x38] sm:$0xff] %v764_v40  ;;  %v431_v42 = vpop.f32.mrb[7].mxu0  ;;  %490 = vst [vmem:[%s924_s26 + $0x78] sm:$0xff] %v772_v41  ;;  %v463_v43 = vpop.f32.mrb[7].mxu1  ;;  %v519_v50 = vmul.f32 %v764_v40, %v764_v40  ;;  %v524_v1 = vmul.f32 %v460_v36, %v460_v36  ;;  %v527_v10 = vmul.f32 %v772_v41, %v772_v41 }
 0x111   : > { %v531_v44 = vadd.f32 %v530_v39, %v516_v38  ;;  %480 = vst [vmem:[%s924_s26 + $0x28] sm:$0xff] %v431_v42  ;;  %v495_v45 = vadd.f32 %v494_v37, %v431_v42  ;;  %v517_v46 = vmul.f32 %v431_v42, %v431_v42  ;;  %488 = vst [vmem:[%s924_s26 + $0x68] sm:$0xff] %v463_v43 }
 0x112   : > { %v525_v6 = vmul.f32 %v463_v43, %v463_v43 }
 0x113   : > { %v496_v48 = vadd.f32 %v763_v32, %v495_v45  ;;  %v532_v49 = vadd.f32 %v531_v44, %v517_v46 }
 0x115   : > { %v533_v51 = vadd.f32 %v532_v49, %v518_v47  ;;  %v497_v52 = vadd.f32 %v764_v40, %v496_v48 }
 0x117   : > { %v498_v54 = vadd.f32 %v497_v52, %v444_v19  ;;  %v534_v55 = vadd.f32 %v533_v51, %v519_v50 }
 0x119   : > { %v535_v56 = vadd.f32 %v534_v55, %v520_v53  ;;  %v499_v57 = vadd.f32 %v498_v54, %v447_v23 }
 0x11b   : > { %v500_v60 = vadd.f32 %v767_v17, %v499_v57  ;;  %v536_v61 = vadd.f32 %v535_v56, %v521_v58 }
 0x11d   : > { %v537_v63 = vadd.f32 %v536_v61, %v522_v59  ;;  %v501_v0 = vadd.f32 %v768_v21, %v500_v60 }
 0x11f   : > { %v502_v2 = vadd.f32 %v501_v0, %v460_v36  ;;  %v538_v3 = vadd.f32 %v537_v63, %v523_v62 }
 0x121   : > { %v539_v4 = vadd.f32 %v538_v3, %v524_v1  ;;  %v503_v5 = vadd.f32 %v502_v2, %v463_v43 }
 0x123   : > { %v504_v8 = vadd.f32 %v771_v34, %v503_v5  ;;  %v540_v9 = vadd.f32 %v539_v4, %v525_v6 }
 0x125   : > { %v505_v11 = vadd.f32 %v772_v41, %v504_v8  ;;  %v541_v12 = vadd.f32 %v540_v9, %v526_v7 }
 0x127   : > { %v506_v13 = vrot.slane %v505_v11, 4  ;;  %v542_v14 = vadd.f32 %v541_v12, %v527_v10 }
 0x129   : > { %v507_v15 = vadd.f32 %v506_v13, %v505_v11  ;;  %v543_v16 = vrot.slane %v542_v14, 4 }
 0x12b   : > { %v508_v17 = vrot.slane %v507_v15, 2  ;;  %v544_v18 = vadd.f32 %v543_v16, %v542_v14 }
 0x12d   : > { %v509_v19 = vadd.f32 %v508_v17, %v507_v15  ;;  %v545_v20 = vrot.slane %v544_v18, 2 }
 0x12f   : > { %v510_v21 = vrot.slane %v509_v19, 1  ;;  %v546_v22 = vadd.f32 %v545_v20, %v544_v18 }
 0x131   : > { %v547_v23 = vrot.slane %v546_v22, 1  ;;  %v511_v24 = vadd.f32 %v510_v21, %v509_v19 }
 0x133   : > { %v548_v25 = vadd.f32 %v547_v23, %v546_v22 }
 0x135   : > { %v550_v26 = vsel %vm549_vm0, %v511_v24, %v548_v25 }
 0x136   : > { %551 = vst [vmem:[%s248_s30] sm:$0x3] %v550_v26 }
 0x137 PF: > { %s14_s14 = sadd.s32 1, %s851_s14   ;;  %s959_s12 = smov %s847_s13 }
 0x138   : > { %p11_p5 = scmp.ge.s32.totalorder %s14_s14, 6   ;;  %s960_s13 = smov %s962_s15 }
 0x13a   :  { %13 = sbr.rel (!%p11_p5) target bundleno = 2 (0x2), region = 73 }

// kernel: unet_innermost_forward.5
= control target key start
LH: loop header
LB: loop body
LE: loop exit
PB: predicated region body
PF: predicated region fallthrough
CT: control target
= control target key end

     0   :  { %s357_s12 = smov 0   ;;  %s434_s0 = inlined_call_operand.vmem [shape: f32[512,128], index: 0, kind: input, shape index: {}]   ;;  %s435_s1 = inlined_call_operand.vmem [shape: f32[1,128], index: 1, kind: input, shape index: {}]   ;;  %s436_s2 = inlined_call_operand.vmem [shape: f32[1,128], index: 2, kind: input, shape index: {}]   ;;  %s437_s3 = inlined_call_operand.vmem [shape: f32[512,128], index: 3, kind: output, shape index: {}]  }
   0x1 LB: > { %s308_s13 = sadd.s32 4294967295, %s335_s12   ;;  %p312_p0 = scmp.ge.s32.totalorder %s335_s12, 1  ;;  %s335_s12 = sphi %s357_s12, %s13_s12  }
   0x2   : > { %p138_p1 = scmp.lt.s32.totalorder %s335_s12, 5 }
   0x4   : > { %p139_p2 = pnand %p312_p0, %p138_p1 }
   0x5   : > { %s313_s14 = sshll.u32 (!%p139_p2), %s308_s13, 4  ;;  %v317_v0 = vld [vmem:[%s435_s1] ss:$0 sm:$0xff] (!%p139_p2) }
   0x6   : > { %142 = sbr.rel (%p139_p2) target bundleno = 30 (0x1e), region = 32  ;;  %p163_p3 = scmp.lt.s32.totalorder (!%p139_p2), %s313_s14, 63  ;;  %v376_v1 = vld [vmem:[%s436_s2] ss:$0 sm:$0xff] (!%p139_p2) }
   0xd   : > { %s439_s14 = smov (!%p163_p3, %s313_s14), 63 }
   0xe   : > { %s314_s15 = sshll.u32 %s439_s14, 3 }
   0xf   : > { %s371_s20 = scalar_lea.vmem %s434_s0, %s314_s15  ;;  %s387_s25 = scalar_lea.vmem %s437_s3, %s314_s15 }
  0x10   : > { %v174_v2 = vld [vmem:[%s371_s20] sm:$0xff]  ;;  %v175_v3 = vld [vmem:[%s371_s20 + $0x8] sm:$0xff]  ;;  %v176_v4 = vld [vmem:[%s371_s20 + $0x10] sm:$0xff] }
  0x11   : > { %v197_v5 = vmul.f32 %v317_v0, %v174_v2  ;;  %v198_v6 = vmul.f32 %v317_v0, %v175_v3  ;;  %v199_v7 = vmul.f32 %v317_v0, %v176_v4  ;;  %v177_v8 = vld [vmem:[%s371_s20 + $0x18] sm:$0xff]  ;;  %v178_v9 = vld [vmem:[%s371_s20 + $0x20] sm:$0xff]  ;;  %v179_v10 = vld [vmem:[%s371_s20 + $0x28] sm:$0xff] }
  0x12   : > { %v200_v11 = vmul.f32 %v317_v0, %v177_v8  ;;  %v201_v12 = vmul.f32 %v317_v0, %v178_v9  ;;  %v202_v13 = vmul.f32 %v317_v0, %v179_v10  ;;  %v180_v14 = vld [vmem:[%s371_s20 + $0x30] sm:$0xff]  ;;  %v181_v15 = vld [vmem:[%s371_s20 + $0x38] sm:$0xff]  ;;  %v182_v16 = vld [vmem:[%s371_s20 + $0x40] sm:$0xff] }
  0x13   : > { %v220_v17 = vadd.f32 %v376_v1, %v197_v5  ;;  %v221_v18 = vadd.f32 %v376_v1, %v198_v6  ;;  %v222_v19 = vadd.f32 %v376_v1, %v199_v7  ;;  %v203_v20 = vmul.f32 %v317_v0, %v180_v14  ;;  %v183_v21 = vld [vmem:[%s371_s20 + $0x48] sm:$0xff]  ;;  %v184_v22 = vld [vmem:[%s371_s20 + $0x50] sm:$0xff]  ;;  %v185_v23 = vld [vmem:[%s371_s20 + $0x58] sm:$0xff] }
  0x14   : > { %v223_v24 = vadd.f32 %v376_v1, %v200_v11  ;;  %v224_v25 = vadd.f32 %v376_v1, %v201_v12  ;;  %v225_v26 = vadd.f32 %v376_v1, %v202_v13  ;;  %v204_v27 = vmul.f32 %v317_v0, %v181_v15  ;;  %v186_v28 = vld [vmem:[%s371_s20 + $0x60] sm:$0xff]  ;;  %v187_v29 = vld [vmem:[%s371_s20 + $0x68] sm:$0xff]  ;;  %v188_v30 = vld [vmem:[%s371_s20 + $0x70] sm:$0xff] }
  0x15   : > { %236 = vst [vmem:[%s387_s25] sm:$0xff] %v220_v17  ;;  %237 = vst [vmem:[%s387_s25 + $0x8] sm:$0xff] %v221_v18  ;;  %v226_v31 = vadd.f32 %v376_v1, %v203_v20  ;;  %v205_v32 = vmul.f32 %v317_v0, %v182_v16  ;;  %v206_v33 = vmul.f32 %v317_v0, %v183_v21  ;;  %v189_v35 = vld [vmem:[%s371_s20 + $0x78] sm:$0xff] }
  0x16   : > { %238 = vst [vmem:[%s387_s25 + $0x10] sm:$0xff] %v222_v19  ;;  %v207_v34 = vmul.f32 %v317_v0, %v184_v22  ;;  %239 = vst [vmem:[%s387_s25 + $0x18] sm:$0xff] %v223_v24  ;;  %v227_v36 = vadd.f32 %v376_v1, %v204_v27  ;;  %v208_v37 = vmul.f32 %v317_v0, %v185_v23 }
  0x17   : > { %240 = vst [vmem:[%s387_s25 + $0x20] sm:$0xff] %v224_v25  ;;  %241 = vst [vmem:[%s387_s25 + $0x28] sm:$0xff] %v225_v26  ;;  %v209_v38 = vmul.f32 %v317_v0, %v186_v28  ;;  %v210_v39 = vmul.f32 %v317_v0, %v187_v29  ;;  %v228_v40 = vadd.f32 %v376_v1, %v205_v32 }
  0x18   : > { %242 = vst [vmem:[%s387_s25 + $0x30] sm:$0xff] %v226_v31  ;;  %v229_v41 = vadd.f32 %v376_v1, %v206_v33  ;;  %v230_v42 = vadd.f32 %v376_v1, %v207_v34  ;;  %v211_v43 = vmul.f32 %v317_v0, %v188_v30  ;;  %243 = vst [vmem:[%s387_s25 + $0x38] sm:$0xff] %v227_v36 }
  0x19   : > { %v231_v44 = vadd.f32 %v376_v1, %v208_v37  ;;  %v232_v45 = vadd.f32 %v376_v1, %v209_v38  ;;  %v233_v46 = vadd.f32 %v376_v1, %v210_v39  ;;  %v212_v47 = vmul.f32 %v317_v0, %v189_v35  ;;  %244 = vst [vmem:[%s387_s25 + $0x40] sm:$0xff] %v228_v40 }
  0x1a   : > { %245 = vst [vmem:[%s387_s25 + $0x48] sm:$0xff] %v229_v41  ;;  %246 = vst [vmem:[%s387_s25 + $0x50] sm:$0xff] %v230_v42  ;;  %v234_v48 = vadd.f32 %v376_v1, %v211_v43 }
  0x1b   : > { %247 = vst [vmem:[%s387_s25 + $0x58] sm:$0xff] %v231_v44  ;;  %248 = vst [vmem:[%s387_s25 + $0x60] sm:$0xff] %v232_v45  ;;  %v235_v49 = vadd.f32 %v376_v1, %v212_v47 }
  0x1c   : > { %249 = vst [vmem:[%s387_s25 + $0x68] sm:$0xff] %v233_v46  ;;  %250 = vst [vmem:[%s387_s25 + $0x70] sm:$0xff] %v234_v48 }
  0x1d   : > { %251 = vst [vmem:[%s387_s25 + $0x78] sm:$0xff] %v235_v49 }
  0x1e PF: > { %s13_s12 = sadd.s32 1, %s335_s12  }
  0x1f   : > { %p10_p4 = scmp.ge.s32.totalorder %s13_s12, 6  }
  0x21   :  { %12 = sbr.rel (!%p10_p4) target bundleno = 1 (0x1), region = 62 }

</bundles_post_ra>
